<compile_context>
chip_gen: v6e
topology: v6e:2x2x1
jax: 0.10.0
libtpu: 0.0.40
codegen_flags: <defaults>
</compile_context>

<pallas_src>
import jax
import jax.numpy as jnp
from jax.experimental import pallas as pl
from jax.experimental.pallas import tpu as pltpu

EPS = 1e-5
LANE = 128


def _round_up(n, m):
    return ((n + m - 1) // m) * m


def _pad2(a, rows, cols):
    return jnp.pad(a, ((0, rows - a.shape[0]), (0, cols - a.shape[1])))


def _bn_affine(h, gamma, beta):
    """Training-mode BatchNorm1d fused to one scale/shift (f32, two-pass variance)."""
    mu = jnp.mean(h, axis=0, keepdims=True)
    d = h - mu
    var = jnp.mean(d * d, axis=0, keepdims=True)      # biased (training-mode) variance
    scale = gamma * jax.lax.rsqrt(var + EPS)           # rsqrt -> EUP slot (free-ish)
    return d * scale + beta


def mlp_kernel(x_ref, w1_ref, w2_ref, w3_ref, vec1_ref, vec2_ref, b3_ref,
               out_ref, acc_ref):
    j = pl.program_id(0)
    tile_h = w1_ref.shape[1]

    @pl.when(j == 0)
    def _():
        acc_ref[...] = jnp.zeros_like(acc_ref)

    # fc1 for this hidden-feature block (bf16 x bf16 -> f32; bias dropped: cancels
    # under training-mode BN).
    h = jnp.dot(x_ref[...], w1_ref[...], preferred_element_type=jnp.float32)

    # bn1 -> relu.  gamma/beta are sliced from the single resident packed vector
    # instead of DMA-ing a padded (2, tile_h) block every step.
    col0 = pl.multiple_of(j * tile_h, 128)
    gb1 = vec1_ref[:, pl.ds(col0, tile_h)]             # (2, tile_h) f32
    h = _bn_affine(h, gb1[0:1, :], gb1[1:2, :])
    h = jnp.maximum(h, 0.0)

    # Partial fc2 contraction for this hidden block (bf16 MXU, f32 accumulation).
    acc_ref[...] += jnp.dot(h.astype(jnp.bfloat16), w2_ref[...],
                            preferred_element_type=jnp.float32)

    @pl.when(j == pl.num_programs(0) - 1)
    def _():
        # bn2 -> relu -> fc3 (+ b3), single finalize on the last block.
        h2 = _bn_affine(acc_ref[...], vec2_ref[0:1, :], vec2_ref[1:2, :])
        h2 = jnp.maximum(h2, 0.0)
        y = jnp.dot(h2.astype(jnp.bfloat16), w3_ref[...],
                    preferred_element_type=jnp.float32) + b3_ref[...]
        out_ref[...] = y.astype(out_ref.dtype)


def _vmem_limit_bytes():
    """Generation-aware VMEM cap (v5e/v6e: 128 MiB physical, 16/32 MiB scoped
    default; v7x: 64 MiB physical).  Leave headroom for Mosaic-internal scratch."""
    try:
        phys = int(pltpu.get_tpu_info().vmem_capacity_bytes)
    except Exception:   # query unavailable -> assume the smallest (v7x) physical VMEM
        phys = 64 * 1024 * 1024
    return max(min(phys - 16 * 1024 * 1024, 96 * 1024 * 1024), 16 * 1024 * 1024)


def _pick_tile_h(B, in_p, h_p, out_p, budget_bytes):
    """Largest hidden-block tile that fits the VMEM budget.  Prefer a single grid
    step (no per-step overhead); otherwise the largest 256-aligned tile (v6e/v7x
    MXU width), falling back to 128 (v5e-native)."""
    def vmem_use(t):
        dbl = 2                                          # Pallas double-buffers blocks
        use = dbl * (in_p * t + t * h_p) * 2             # streamed w1 / w2 blocks (bf16)
        use += dbl * (B * in_p + h_p * out_p) * 2        # resident x / w3 (bf16)
        use += dbl * (2 * h_p + 2 * h_p + out_p) * 4     # vec1, vec2, b3 (f32)
        use += dbl * B * out_p * 4                       # output block (f32)
        use += B * h_p * 4                               # fc2 accumulator scratch
        return use

    cands = [h_p] + [t for t in (4096, 2048, 1024, 512, 256, 128)
                     if t < h_p and h_p % t == 0]
    for t in cands:
        if vmem_use(t) <= budget_bytes:
            return t
    return 128


def improved_mlp_forward(x, params):
    """x: [B, input_dim] float32. params: dict of weights (Linear weights already
    stored as [in, out]).  Returns [B, output_dim] float32."""
    B, in_dim = x.shape
    hidden = params["w1"].shape[1]
    out_dim = params["w3"].shape[1]

    # Feature padding: hidden / output dims to lane multiples (lane-dense matmuls
    # and unmasked output stores); the contraction dim only to a sublane multiple
    # (its blocks cover the full dim, so no 8x inflation to 128 is needed).
    in_p = _round_up(in_dim, 8)
    h_p = _round_up(hidden, LANE)
    out_p = _round_up(out_dim, LANE)

    vmem_limit = _vmem_limit_bytes()
    tile_h = _pick_tile_h(B, in_p, h_p, out_p, vmem_limit - 8 * 1024 * 1024)

    # bf16 weights / matmul activations; BN math and accumulation stay f32.
    # (In a real deployment the padding / packing / casting below is done once, offline.)
    x_p = _pad2(x.astype(jnp.float32), B, in_p).astype(jnp.bfloat16)
    w1 = _pad2(params["w1"], in_p, h_p).astype(jnp.bfloat16)
    w2 = _pad2(params["w2"], h_p, h_p).astype(jnp.bfloat16)
    w3 = _pad2(params["w3"], h_p, out_p).astype(jnp.bfloat16)
    # Packed per-feature vectors: rows = [gamma; beta] (f32).
    vec1 = _pad2(jnp.concatenate([params["g1"], params["be1"]], axis=0), 2, h_p)
    vec2 = _pad2(jnp.concatenate([params["g2"], params["be2"]], axis=0), 2, h_p)
    b3 = _pad2(params["b3"], 1, out_p)

    grid = (h_p // tile_h,)

    in_specs = [
        pl.BlockSpec((B, in_p), lambda j: (0, 0)),        # x: resident
        pl.BlockSpec((in_p, tile_h), lambda j: (0, j)),   # w1: stream column blocks
        pl.BlockSpec((tile_h, h_p), lambda j: (j, 0)),    # w2: stream row blocks
        pl.BlockSpec((h_p, out_p), lambda j: (0, 0)),     # w3: resident
        pl.BlockSpec((2, h_p), lambda j: (0, 0)),         # [g1; be1] resident (sliced in-kernel)
        pl.BlockSpec((2, h_p), lambda j: (0, 0)),         # [g2; be2] resident
        pl.BlockSpec((1, out_p), lambda j: (0, 0)),       # b3 resident
    ]
    out_specs = pl.BlockSpec((B, out_p), lambda j: (0, 0))

    cost = pl.CostEstimate(
        flops=int(2 * B * (in_p * h_p + h_p * h_p + h_p * out_p)),
        transcendentals=int(2 * h_p),
        bytes_accessed=int(
            (x_p.size + w1.size + w2.size + w3.size) * 2
            + (vec1.size + vec2.size + b3.size) * 4
            + B * out_p * 4),
    )

    y_p = pl.pallas_call(
        mlp_kernel,
        out_shape=jax.ShapeDtypeStruct((B, out_p), jnp.float32),
        grid=grid,
        in_specs=in_specs,
        out_specs=out_specs,
        scratch_shapes=[pltpu.VMEM((B, h_p), jnp.float32)],   # fc2 accumulator
        compiler_params=pltpu.CompilerParams(
            # Single reduction-like axis over hidden blocks (output written last step).
            dimension_semantics=("arbitrary",),
            vmem_limit_bytes=int(vmem_limit),
        ),
        cost_estimate=cost,
    )(x_p, w1, w2, w3, vec1, vec2, b3)

    return y_p[:, :out_dim]


def init_params(key, input_dim, hidden_dim, output_dim):
    """PyTorch-default-style init: Linear uniform(+-1/sqrt(fan_in)), BN gamma=1 beta=0."""
    ks = jax.random.split(key, 6)

    def linear(kw, kb, fan_in, fan_out):
        bound = 1.0 / jnp.sqrt(jnp.float32(fan_in))
        w = jax.random.uniform(kw, (fan_in, fan_out), jnp.float32, -bound, bound)
        b = jax.random.uniform(kb, (1, fan_out), jnp.float32, -bound, bound)
        return w, b

    w1, b1 = linear(ks[0], ks[1], input_dim, hidden_dim)
    w2, b2 = linear(ks[2], ks[3], hidden_dim, hidden_dim)
    w3, b3 = linear(ks[4], ks[5], hidden_dim, output_dim)

    return {
        "w1": w1, "b1": b1,
        "g1": jnp.ones((1, hidden_dim), jnp.float32),
        "be1": jnp.zeros((1, hidden_dim), jnp.float32),
        "w2": w2, "b2": b2,
        "g2": jnp.ones((1, hidden_dim), jnp.float32),
        "be2": jnp.zeros((1, hidden_dim), jnp.float32),
        "w3": w3, "b3": b3,
    }


def reference_forward(x, p):
    """Exact PyTorch forward semantics (including the b1/b2 biases the kernel drops
    algebraically), in full f32 precision."""
    hi = jax.lax.Precision.HIGHEST

    def bn(h, g, be):
        mu = jnp.mean(h, axis=0, keepdims=True)
        var = jnp.mean((h - mu) ** 2, axis=0, keepdims=True)
        return (h - mu) * jax.lax.rsqrt(var + EPS) * g + be

    h = jnp.maximum(bn(jnp.dot(x, p["w1"], precision=hi) + p["b1"],
                       p["g1"], p["be1"]), 0.0)
    h = jnp.maximum(bn(jnp.dot(h, p["w2"], precision=hi) + p["b2"],
                       p["g2"], p["be2"]), 0.0)
    return jnp.dot(h, p["w3"], precision=hi) + p["b3"]


if __name__ == "__main__":
    # hidden_dim=256: fits VMEM easily, so the hidden-block grid collapses to 1 step.
    batch, input_dim, hidden_dim, output_dim = 8, 16, 256, 8

    key = jax.random.PRNGKey(0)
    k_x, k_p = jax.random.split(key)
    x = jax.random.normal(k_x, (batch, input_dim), jnp.float32)
    params = init_params(k_p, input_dim, hidden_dim, output_dim)

    out = improved_mlp_forward(x, params)
    out = jax.block_until_ready(out)

    ref = reference_forward(x, params)
    assert out.shape == (batch, output_dim)
    err = float(jnp.max(jnp.abs(out - ref)))
    # bf16 weights/activations on the MXU (f32 accumulation) vs. a full-f32
    # reference: tolerance re-validated for bf16 numerics.
    assert err < 5e-2, f"max abs err {err}"

    print("KERNEL_OK")
</pallas_src>

<mosaic_0001>
module attributes {stable_mosaic.version = 11 : i64} {
  func.func @mlp_kernel(%arg0: i32, %arg1: memref<8x16xbf16, #tpu.memory_space<vmem>>, %arg2: memref<16x256xbf16, #tpu.memory_space<vmem>>, %arg3: memref<256x256xbf16, #tpu.memory_space<vmem>>, %arg4: memref<256x128xbf16, #tpu.memory_space<vmem>>, %arg5: memref<2x256xf32, #tpu.memory_space<vmem>>, %arg6: memref<2x256xf32, #tpu.memory_space<vmem>>, %arg7: memref<1x128xf32, #tpu.memory_space<vmem>>, %arg8: memref<8x128xf32, #tpu.memory_space<vmem>>, %arg9: memref<8x256xf32, #tpu.memory_space<vmem>>) attributes {dimension_semantics = [#tpu.dimension_semantics<arbitrary>], iteration_bounds = array<i64: 1>, scalar_prefetch = 0 : i64, scratch_operands = 1 : i64, tpu.core_type = #tpu.core_type<tc>, window_params = [{pipeline_mode = #tpu.pipeline_mode<synchronous>, transform_indices = @transform_0, window_bounds = array<i64: 8, 16>}, {transform_indices = @transform_1, window_bounds = array<i64: 16, 256>}, {transform_indices = @transform_2, window_bounds = array<i64: 256, 256>}, {pipeline_mode = #tpu.pipeline_mode<synchronous>, transform_indices = @transform_3, window_bounds = array<i64: 256, 128>}, {pipeline_mode = #tpu.pipeline_mode<synchronous>, transform_indices = @transform_4, window_bounds = array<i64: 2, 256>}, {pipeline_mode = #tpu.pipeline_mode<synchronous>, transform_indices = @transform_5, window_bounds = array<i64: 2, 256>}, {pipeline_mode = #tpu.pipeline_mode<synchronous>, transform_indices = @transform_6, window_bounds = array<i64: 1, 128>}, {pipeline_mode = #tpu.pipeline_mode<synchronous>, transform_indices = @transform_7, window_bounds = array<i64: 8, 128>}]} {
    %c0_i32 = arith.constant 0 : i32
    %0 = arith.cmpi eq, %arg0, %c0_i32 : i32
    %1 = arith.extui %0 : i1 to i32
    %c0_i32_0 = arith.constant 0 : i32
    %2 = arith.cmpi ne, %1, %c0_i32_0 : i32
    scf.if %2 {
      %cst_20 = arith.constant 0.000000e+00 : f32
      %42 = vector.broadcast %cst_20 : f32 to vector<8x256xf32>
      %c0_21 = arith.constant 0 : index
      %c0_22 = arith.constant 0 : index
      %43 = vector.load %arg9[%c0_21, %c0_22] : memref<8x256xf32, #tpu.memory_space<vmem>>, vector<8x256xf32>
      tpu.vector_store %arg9[%c0_21, %c0_22], %42 {strides = array<i32>} : memref<8x256xf32, #tpu.memory_space<vmem>>, vector<8x256xf32>,
    } else {
    }
    %c0 = arith.constant 0 : index
    %c0_1 = arith.constant 0 : index
    %3 = vector.load %arg1[%c0, %c0_1] : memref<8x16xbf16, #tpu.memory_space<vmem>>, vector<8x16xbf16>
    %c0_2 = arith.constant 0 : index
    %c0_3 = arith.constant 0 : index
    %4 = vector.load %arg2[%c0_2, %c0_3] : memref<16x256xbf16, #tpu.memory_space<vmem>>, vector<16x256xbf16>
    %cst = arith.constant dense<0.000000e+00> : vector<8x256xf32>
    %5 = tpu.matmul %3, %4, %cst {dimension_numbers = #tpu.dot_dimension_numbers<[1], [0], [0], [1], [0, 0, 1, 1], [], []>} : vector<8x16xbf16>, vector<16x256xbf16>, vector<8x256xf32> -> vector<8x256xf32>
    %c256_i32 = arith.constant 256 : i32
    %6 = arith.muli %arg0, %c256_i32 : i32
    %7 = tpu.assume_multiple %6, 128 : i32
    %c0_4 = arith.constant 0 : index
    %8 = arith.index_cast %7 : i32 to index
    %9 = vector.load %arg5[%c0_4, %8] : memref<2x256xf32, #tpu.memory_space<vmem>>, vector<2x256xf32>
    %10 = vector.extract_strided_slice %9 {offsets = [0, 0], sizes = [1, 256], strides = [1, 1]} : vector<2x256xf32> to vector<1x256xf32>
    %11 = vector.extract_strided_slice %9 {offsets = [1, 0], sizes = [1, 256], strides = [1, 1]} : vector<2x256xf32> to vector<1x256xf32>
    %cst_5 = arith.constant dense<0.000000e+00> : vector<256xf32>
    %12 = vector.multi_reduction <add>, %5, %cst_5 [0] : vector<8x256xf32> to vector<256xf32>
    %13 = vector.shape_cast %12 : vector<256xf32> to vector<1x256xf32>
    %cst_6 = arith.constant 8.000000e+00 : f32
    %14 = vector.broadcast %cst_6 : f32 to vector<1x256xf32>
    %15 = arith.divf %13, %14 : vector<1x256xf32>
    %16 = vector.broadcast %15 : vector<1x256xf32> to vector<8x256xf32>
    %17 = arith.subf %5, %16 : vector<8x256xf32>
    %18 = arith.mulf %17, %17 : vector<8x256xf32>
    %cst_7 = arith.constant dense<0.000000e+00> : vector<256xf32>
    %19 = vector.multi_reduction <add>, %18, %cst_7 [0] : vector<8x256xf32> to vector<256xf32>
    %20 = vector.shape_cast %19 : vector<256xf32> to vector<1x256xf32>
    %cst_8 = arith.constant 8.000000e+00 : f32
    %21 = vector.broadcast %cst_8 : f32 to vector<1x256xf32>
    %22 = arith.divf %20, %21 : vector<1x256xf32>
    %cst_9 = arith.constant 9.99999974E-6 : f32
    %23 = vector.broadcast %cst_9 : f32 to vector<1x256xf32>
    %24 = arith.addf %22, %23 : vector<1x256xf32>
    %25 = math.rsqrt %24 : vector<1x256xf32>
    %26 = arith.mulf %10, %25 : vector<1x256xf32>
    %27 = vector.broadcast %26 : vector<1x256xf32> to vector<8x256xf32>
    %28 = arith.mulf %17, %27 : vector<8x256xf32>
    %29 = vector.broadcast %11 : vector<1x256xf32> to vector<8x256xf32>
    %30 = arith.addf %28, %29 : vector<8x256xf32>
    %cst_10 = arith.constant 0.000000e+00 : f32
    %31 = vector.broadcast %cst_10 : f32 to vector<8x256xf32>
    %32 = arith.maximumf %30, %31 : vector<8x256xf32>
    %c0_11 = arith.constant 0 : index
    %c0_12 = arith.constant 0 : index
    %33 = vector.load %arg9[%c0_11, %c0_12] : memref<8x256xf32, #tpu.memory_space<vmem>>, vector<8x256xf32>
    %34 = arith.truncf %32 : vector<8x256xf32> to vector<8x256xbf16>
    %c0_13 = arith.constant 0 : index
    %c0_14 = arith.constant 0 : index
    %35 = vector.load %arg3[%c0_13, %c0_14] : memref<256x256xbf16, #tpu.memory_space<vmem>>, vector<256x256xbf16>
    %cst_15 = arith.constant dense<0.000000e+00> : vector<8x256xf32>
    %36 = tpu.matmul %34, %35, %cst_15 {dimension_numbers = #tpu.dot_dimension_numbers<[1], [0], [0], [1], [0, 0, 1, 1], [], []>} : vector<8x256xbf16>, vector<256x256xbf16>, vector<8x256xf32> -> vector<8x256xf32>
    %37 = arith.addf %33, %36 : vector<8x256xf32>
    %c0_16 = arith.constant 0 : index
    %c0_17 = arith.constant 0 : index
    %38 = vector.load %arg9[%c0_16, %c0_17] : memref<8x256xf32, #tpu.memory_space<vmem>>, vector<8x256xf32>
    tpu.vector_store %arg9[%c0_16, %c0_17], %37 {strides = array<i32>} : memref<8x256xf32, #tpu.memory_space<vmem>>, vector<8x256xf32>,
    %c0_i32_18 = arith.constant 0 : i32
    %39 = arith.cmpi eq, %arg0, %c0_i32_18 : i32
    %40 = arith.extui %39 : i1 to i32
    %c0_i32_19 = arith.constant 0 : i32
    %41 = arith.cmpi ne, %40, %c0_i32_19 : i32
    scf.if %41 {
      %c0_20 = arith.constant 0 : index
      %c0_21 = arith.constant 0 : index
      %42 = vector.load %arg9[%c0_20, %c0_21] : memref<8x256xf32, #tpu.memory_space<vmem>>, vector<8x256xf32>
      %c0_22 = arith.constant 0 : index
      %c0_23 = arith.constant 0 : index
      %43 = vector.load %arg6[%c0_22, %c0_23] : memref<2x256xf32, #tpu.memory_space<vmem>>, vector<1x256xf32>
      %c1 = arith.constant 1 : index
      %c0_24 = arith.constant 0 : index
      %44 = vector.load %arg6[%c1, %c0_24] : memref<2x256xf32, #tpu.memory_space<vmem>>, vector<1x256xf32>
      %cst_25 = arith.constant dense<0.000000e+00> : vector<256xf32>
      %45 = vector.multi_reduction <add>, %42, %cst_25 [0] : vector<8x256xf32> to vector<256xf32>
      %46 = vector.shape_cast %45 : vector<256xf32> to vector<1x256xf32>
      %cst_26 = arith.constant 8.000000e+00 : f32
      %47 = vector.broadcast %cst_26 : f32 to vector<1x256xf32>
      %48 = arith.divf %46, %47 : vector<1x256xf32>
      %49 = vector.broadcast %48 : vector<1x256xf32> to vector<8x256xf32>
      %50 = arith.subf %42, %49 : vector<8x256xf32>
      %51 = arith.mulf %50, %50 : vector<8x256xf32>
      %cst_27 = arith.constant dense<0.000000e+00> : vector<256xf32>
      %52 = vector.multi_reduction <add>, %51, %cst_27 [0] : vector<8x256xf32> to vector<256xf32>
      %53 = vector.shape_cast %52 : vector<256xf32> to vector<1x256xf32>
      %cst_28 = arith.constant 8.000000e+00 : f32
      %54 = vector.broadcast %cst_28 : f32 to vector<1x256xf32>
      %55 = arith.divf %53, %54 : vector<1x256xf32>
      %cst_29 = arith.constant 9.99999974E-6 : f32
      %56 = vector.broadcast %cst_29 : f32 to vector<1x256xf32>
      %57 = arith.addf %55, %56 : vector<1x256xf32>
      %58 = math.rsqrt %57 : vector<1x256xf32>
      %59 = arith.mulf %43, %58 : vector<1x256xf32>
      %60 = vector.broadcast %59 : vector<1x256xf32> to vector<8x256xf32>
      %61 = arith.mulf %50, %60 : vector<8x256xf32>
      %62 = vector.broadcast %44 : vector<1x256xf32> to vector<8x256xf32>
      %63 = arith.addf %61, %62 : vector<8x256xf32>
      %cst_30 = arith.constant 0.000000e+00 : f32
      %64 = vector.broadcast %cst_30 : f32 to vector<8x256xf32>
      %65 = arith.maximumf %63, %64 : vector<8x256xf32>
      %66 = arith.truncf %65 : vector<8x256xf32> to vector<8x256xbf16>
      %c0_31 = arith.constant 0 : index
      %c0_32 = arith.constant 0 : index
      %67 = vector.load %arg4[%c0_31, %c0_32] : memref<256x128xbf16, #tpu.memory_space<vmem>>, vector<256x128xbf16>
      %cst_33 = arith.constant dense<0.000000e+00> : vector<8x128xf32>
      %68 = tpu.matmul %66, %67, %cst_33 {dimension_numbers = #tpu.dot_dimension_numbers<[1], [0], [0], [1], [0, 0, 1, 1], [], []>} : vector<8x256xbf16>, vector<256x128xbf16>, vector<8x128xf32> -> vector<8x128xf32>
      %c0_34 = arith.constant 0 : index
      %c0_35 = arith.constant 0 : index
      %69 = vector.load %arg7[%c0_34, %c0_35] : memref<1x128xf32, #tpu.memory_space<vmem>>, vector<1x128xf32>
      %70 = vector.broadcast %69 : vector<1x128xf32> to vector<8x128xf32>
      %71 = arith.addf %68, %70 : vector<8x128xf32>
      %c0_36 = arith.constant 0 : index
      %c0_37 = arith.constant 0 : index
      %72 = vector.load %arg8[%c0_36, %c0_37] : memref<8x128xf32, #tpu.memory_space<vmem>>, vector<8x128xf32>
      tpu.vector_store %arg8[%c0_36, %c0_37], %71 {strides = array<i32>} : memref<8x128xf32, #tpu.memory_space<vmem>>, vector<8x128xf32>,
    } else {
    }
    return
  }
  func.func @transform_0(%arg0: i32) -> (i32, i32) {
    %c0_i32 = arith.constant 0 : i32
    %c0_i32_0 = arith.constant 0 : i32
    %c0_i32_1 = arith.constant 0 : i32
    return %c0_i32, %c0_i32_0 : i32, i32
  }
  func.func @transform_1(%arg0: i32) -> (i32, i32) {
    %c0_i32 = arith.constant 0 : i32
    %c0_i32_0 = arith.constant 0 : i32
    return %c0_i32, %arg0 : i32, i32
  }
  func.func @transform_2(%arg0: i32) -> (i32, i32) {
    %c0_i32 = arith.constant 0 : i32
    %c0_i32_0 = arith.constant 0 : i32
    return %arg0, %c0_i32 : i32, i32
  }
  func.func @transform_3(%arg0: i32) -> (i32, i32) {
    %c0_i32 = arith.constant 0 : i32
    %c0_i32_0 = arith.constant 0 : i32
    %c0_i32_1 = arith.constant 0 : i32
    return %c0_i32, %c0_i32_0 : i32, i32
  }
  func.func @transform_4(%arg0: i32) -> (i32, i32) {
    %c0_i32 = arith.constant 0 : i32
    %c0_i32_0 = arith.constant 0 : i32
    %c0_i32_1 = arith.constant 0 : i32
    return %c0_i32, %c0_i32_0 : i32, i32
  }
  func.func @transform_5(%arg0: i32) -> (i32, i32) {
    %c0_i32 = arith.constant 0 : i32
    %c0_i32_0 = arith.constant 0 : i32
    %c0_i32_1 = arith.constant 0 : i32
    return %c0_i32, %c0_i32_0 : i32, i32
  }
  func.func @transform_6(%arg0: i32) -> (i32, i32) {
    %c0_i32 = arith.constant 0 : i32
    %c0_i32_0 = arith.constant 0 : i32
    %c0_i32_1 = arith.constant 0 : i32
    return %c0_i32, %c0_i32_0 : i32, i32
  }
  func.func @transform_7(%arg0: i32) -> (i32, i32) {
    %c0_i32 = arith.constant 0 : i32
    %c0_i32_0 = arith.constant 0 : i32
    %c0_i32_1 = arith.constant 0 : i32
    return %c0_i32, %c0_i32_0 : i32, i32
  }
}

</mosaic_0001>

<bundles_post_ra>
// kernel: tpu_custom_call.1
= control target key start
LH: loop header
LB: loop body
LE: loop exit
PB: predicated region body
PF: predicated region fallthrough
CT: control target
= control target key end

     0   :  { %12 = vsyncpa [#allocation4], 0  ;;  %s1144_s0 = inlined_call_operand.hbm [shape: bf16[8,16], index: 0, kind: input, shape index: {}]   ;;  %s1145_s1 = inlined_call_operand.hbm [shape: bf16[16,256], index: 1, kind: input, shape index: {}]   ;;  %s1146_s2 = inlined_call_operand.hbm [shape: bf16[256,256], index: 2, kind: input, shape index: {}]   ;;  %s1147_s3 = inlined_call_operand.hbm [shape: bf16[256,128], index: 3, kind: input, shape index: {}]   ;;  %s1148_s4 = inlined_call_operand.vmem [shape: f32[2,256], index: 4, kind: input, shape index: {}]   ;;  %s1149_s5 = inlined_call_operand.vmem [shape: f32[2,256], index: 5, kind: input, shape index: {}]   ;;  %s1150_s6 = inlined_call_operand.vmem [shape: f32[1,128], index: 6, kind: input, shape index: {}]   ;;  %s1151_s7 = inlined_call_operand.hbm [shape: f32[8,128], index: 7, kind: output, shape index: {}]  }
   0x1   :  { %13 = vsyncpa [#allocation7], 0 }
   0x2   :  { %14 = vsyncpa [#allocation10], 0 }
   0x3   :  { %15 = vsyncpa [#allocation5], 0  ;;  %s1043_s24 = smov [#allocation6]  }
   0x4   :  { %s31_s25 = sshll.u32 %s1043_s24, 4  ;;  %s32_s25 = int_to_ptr.vmem [resolvable:$true] %s31_s25 }
   0x5   :  { %s943_s26 = scalar_lea.vmem %s32_s25, 256  ;;  %p948_p1 = scmp.lt.s32.totalorder %s32_s25, %s32_s25 }
   0x6   :  { %p944_p0 = scmp.ne.s32.totalorder %s32_s25, %s943_s26  ;;  %p949_p2 = scmp.lt.s32.totalorder %s943_s26, %s943_s26 }
   0x8   :  { %p950_p3 = por %p949_p2, %p948_p1 }
   0xa   :  { %p951_p4 = pnand %p950_p3, %p944_p0 }
   0xc   :  { %954 = shalt.err (!%p951_p4)
}
   0xd   :  { %s1044_s27 = smov 128   ;;  %s1045_s28 = smov 8  }
   0xe   :  { %37 = dma.hbm_to_vmem [thread:$0]  %s1145_s1, 256, %s32_s25, [#allocation7], %s1044_s27, %s1044_s27, %s1045_s28  }
   0xf   :  { %s1046_s8 = smov [#allocation3]   ;;  %s1047_s10 = smov [#allocation8]  }
  0x10   :  { %s22_s9 = sshll.u32 %s1046_s8, 4  ;;  %s43_s11 = sshll.u32 %s1047_s10, 4  ;;  %s23_s9 = int_to_ptr.vmem [resolvable:$true] %s22_s9  ;;  %s44_s11 = int_to_ptr.vmem [resolvable:$true] %s43_s11 }
  0x11   :  { %s963_s12 = scalar_lea.vmem %s23_s9, 64  ;;  %p968_p6 = scmp.lt.s32.totalorder %s23_s9, %s23_s9 }
  0x12   :  { %p964_p5 = scmp.ne.s32.totalorder %s23_s9, %s963_s12  ;;  %p969_p7 = scmp.lt.s32.totalorder %s963_s12, %s963_s12 }
  0x14   :  { %p970_p8 = por %p969_p7, %p968_p6 }
  0x16   :  { %p971_p9 = pnand %p970_p8, %p964_p5 }
  0x18   :  { %974 = shalt.err (!%p971_p9)
}
  0x19   :  { %25 = dma.hbm_to_vmem [thread:$0]  %s1144_s0, 64, %s23_s9, [#allocation4]  }
  0x1a   :  { %s983_s15 = scalar_lea.vmem %s44_s11, 4096  ;;  %p988_p11 = scmp.lt.s32.totalorder %s44_s11, %s44_s11 }
  0x1b   :  { %p984_p10 = scmp.ne.s32.totalorder %s44_s11, %s983_s15  ;;  %p989_p12 = scmp.lt.s32.totalorder %s983_s15, %s983_s15 }
  0x1d   :  { %p990_p13 = por %p989_p12, %p988_p11 }
  0x1f   :  { %p991_p0 = pnand %p990_p13, %p984_p10 }
  0x21   :  { %994 = shalt.err (!%p991_p0)
}
  0x22   :  { %49 = dma.hbm_to_vmem [thread:$0]  %s1146_s2, 4096, %s44_s11, [#allocation7], %s1044_s27, %s1044_s27, %s1045_s28  }
  0x23   :  { %s1048_s17 = smov [#allocation9]  }
  0x24   :  { %s55_s18 = sshll.u32 %s1048_s17, 4  ;;  %s56_s18 = int_to_ptr.vmem [resolvable:$true] %s55_s18 }
  0x25   :  { %s1003_s19 = scalar_lea.vmem %s56_s18, 2048  ;;  %p1008_p2 = scmp.lt.s32.totalorder %s56_s18, %s56_s18 }
  0x26   :  { %p1004_p1 = scmp.ne.s32.totalorder %s56_s18, %s1003_s19  ;;  %p1009_p3 = scmp.lt.s32.totalorder %s1003_s19, %s1003_s19 }
  0x28   :  { %p1010_p4 = por %p1009_p3, %p1008_p2 }
  0x2a   :  { %p1011_p5 = pnand %p1010_p4, %p1004_p1 }
  0x2c   :  { %1014 = shalt.err (!%p1011_p5)
}
  0x2d   :  { %s1049_s0 = smov 64   ;;  %s1050_s20 = smov 4  }
  0x2e   :  { %61 = dma.hbm_to_vmem [thread:$0]  %s1147_s3, 2048, %s56_s18, [#allocation10], %s1049_s0, %s1049_s0, %s1050_s20  }
  0x2f   :  { %1035 = dma.done.wait [#allocation4], 64  }
  0x30   :  { %1036 = vsyncadd [#allocation4], 4294967232 }
  0x31   :  { %1037 = dma.done.wait [#allocation7], 4352  }
  0x32   :  { %1038 = vsyncadd [#allocation7], 4294962944 }
  0x33   :  { %1039 = dma.done.wait [#allocation10], 2048  }
  0x34   :  { %1040 = vsyncadd [#allocation10], 4294965248  ;;  %v1051_v0 = vmov 0   ;;  %v860_v1 = vld [vmem:[#allocation6 + $0x4] ss:$8 sps:$4 sm:$0xff]   ;;  %vm100_vm0 = vcmask 130048  }
  0x35   :  { %136 = vmatprep.mubr.bf16.mxu0 %v1051_v0  ;;  %v862_v2 = vld [vmem:[#allocation6] ss:$8 sps:$4 sm:$0xff]   ;;  %v87_v3 = vld [vmem:[#allocation3] sm:$0xf]  ;;  %118 = vmatprep.subr.bf16.mxu0 %v860_v1  ;;  %v863_v4 = vld [vmem:[#allocation8 + $0x74] ss:$8 sps:$4 sm:$0xff]  }
  0x36   :  { %119 = vmatpush1.bf16.msra.mxu0 %v862_v2  ;;  %v865_v5 = vld [vmem:[#allocation8 + $0x70] ss:$8 sps:$4 sm:$0xff]   ;;  %440 = vmatprep.subr.bf16.mxu1 %v863_v4  ;;  %v866_v6 = vld [vmem:[#allocation8 + $0x64] ss:$8 sps:$4 sm:$0xff]   ;;  %v868_v7 = vld [vmem:[#allocation8 + $0x60] ss:$8 sps:$4 sm:$0xff]  }
  0x37   :  { %441 = vmatpush1.bf16.msra.mxu1 %v865_v5  ;;  %v869_v8 = vld [vmem:[#allocation8 + $0x54] ss:$8 sps:$4 sm:$0xff]   ;;  %v871_v9 = vld [vmem:[#allocation8 + $0x50] ss:$8 sps:$4 sm:$0xff]   ;;  %v872_v10 = vld [vmem:[#allocation8 + $0x44] ss:$8 sps:$4 sm:$0xff]  }
  0x38   :  { %442 = vmatprep.subr.bf16.mxu1 %v866_v6  ;;  %v874_v11 = vld [vmem:[#allocation8 + $0x40] ss:$8 sps:$4 sm:$0xff]   ;;  %v875_v12 = vld [vmem:[#allocation8 + $0x34] ss:$8 sps:$4 sm:$0xff]   ;;  %v877_v13 = vld [vmem:[#allocation8 + $0x30] ss:$8 sps:$4 sm:$0xff]  }
  0x39   :  { %775 = vmatmul.mubr.msk.bf16.vlgmr.msra.gmra.mxu0 %vm100_vm0, %v87_v3  ;;  %v878_v14 = vld [vmem:[#allocation8 + $0x24] ss:$8 sps:$4 sm:$0xff]   ;;  %v880_v15 = vld [vmem:[#allocation8 + $0x20] ss:$8 sps:$4 sm:$0xff]   ;;  %v881_v16 = vld [vmem:[#allocation8 + $0x14] ss:$8 sps:$4 sm:$0xff]  }
  0x3a   :  { %v883_v17 = vld [vmem:[#allocation8 + $0x10] ss:$8 sps:$4 sm:$0xff]   ;;  %v884_v18 = vld [vmem:[#allocation8 + $0x4] ss:$8 sps:$4 sm:$0xff]   ;;  %v886_v19 = vld [vmem:[#allocation8] ss:$8 sps:$4 sm:$0xff]  }
  0x3b   :  { %443 = vmatpush1.bf16.msra.mxu1 %v868_v7  ;;  %v887_v20 = vld [vmem:[#allocation8 + $0xf4] ss:$8 sps:$4 sm:$0xff]   ;;  %v889_v21 = vld [vmem:[#allocation8 + $0xf0] ss:$8 sps:$4 sm:$0xff]   ;;  %v890_v22 = vld [vmem:[#allocation8 + $0xe4] ss:$8 sps:$4 sm:$0xff]  }
  0x3c   :  { %444 = vmatprep.subr.bf16.mxu1 %v869_v8  ;;  %v892_v23 = vld [vmem:[#allocation8 + $0xe0] ss:$8 sps:$4 sm:$0xff]   ;;  %v893_v24 = vld [vmem:[#allocation8 + $0xd4] ss:$8 sps:$4 sm:$0xff]   ;;  %v895_v25 = vld [vmem:[#allocation8 + $0xd0] ss:$8 sps:$4 sm:$0xff]  }
  0x3d   :  { %v896_v26 = vld [vmem:[#allocation8 + $0xc4] ss:$8 sps:$4 sm:$0xff]   ;;  %v898_v27 = vld [vmem:[#allocation8 + $0xc0] ss:$8 sps:$4 sm:$0xff]   ;;  %v899_v28 = vld [vmem:[#allocation8 + $0xb4] ss:$8 sps:$4 sm:$0xff]  }
  0x3e   :  { %v901_v29 = vld [vmem:[#allocation8 + $0xb0] ss:$8 sps:$4 sm:$0xff]   ;;  %v902_v30 = vld [vmem:[#allocation8 + $0xa4] ss:$8 sps:$4 sm:$0xff]   ;;  %v904_v31 = vld [vmem:[#allocation8 + $0xa0] ss:$8 sps:$4 sm:$0xff]  }
  0x3f   :  { %445 = vmatpush1.bf16.msra.mxu1 %v871_v9  ;;  %v905_v32 = vld [vmem:[#allocation8 + $0x94] ss:$8 sps:$4 sm:$0xff]   ;;  %v907_v33 = vld [vmem:[#allocation8 + $0x90] ss:$8 sps:$4 sm:$0xff]   ;;  %v908_v34 = vld [vmem:[#allocation8 + $0x84] ss:$8 sps:$4 sm:$0xff]  }
  0x40   :  { %446 = vmatprep.subr.bf16.mxu1 %v872_v10  ;;  %v910_v35 = vld [vmem:[#allocation8 + $0x80] ss:$8 sps:$4 sm:$0xff]   ;;  %v1052_v10 = vmov 1983009808   ;;  %s1054_s27 = smov [#allocation11]  }
  0x41   :  { %s760_s28 = sshll.u32 %s1054_s27, 4  ;;  %s761_s28 = int_to_ptr.vmem [resolvable:$true] %s760_s28 }
  0x42   :  { %s1015_s29 = scalar_lea.vmem %s761_s28, 128  ;;  %p1020_p7 = scmp.lt.s32.totalorder %s761_s28, %s761_s28 }
  0x43   :  { %447 = vmatpush1.bf16.msra.mxu1 %v874_v11  ;;  %v192_v11 = vunpack.c.l.s4 %v1052_v10  ;;  %p1016_p6 = scmp.ne.s32.totalorder %s761_s28, %s1015_s29  ;;  %p1021_p8 = scmp.lt.s32.totalorder %s1015_s29, %s1015_s29 }
  0x44   :  { %448 = vmatprep.subr.bf16.mxu1 %v875_v12  ;;  %v194_v12 = vlaneseq }
  0x45   :  { %p1022_p9 = por %p1021_p8, %p1020_p7 }
  0x47   :  { %449 = vmatpush1.bf16.msra.mxu1 %v877_v13  ;;  %v193_v13 = vunpack.c.0.s8 %v192_v11  ;;  %p1023_p10 = pnand %p1022_p9, %p1016_p6 }
  0x48   :  { %450 = vmatprep.subr.bf16.mxu1 %v878_v14  ;;  %v1107_v14 = vshrl.u32 %v194_v12, 7 }
  0x4b   :  { %451 = vmatpush1.bf16.msra.mxu1 %v880_v15 }
  0x4c   :  { %452 = vmatprep.subr.bf16.mxu1 %v881_v16  ;;  %v196_v16 = vsub.s32 %v193_v13, %v1107_v14 }
  0x4f   :  { %453 = vmatpush1.bf16.msra.mxu1 %v883_v17 }
  0x50   :  { %454 = vmatprep.subr.bf16.mxu1 %v884_v18 }
  0x53   :  { %455 = vmatpush1.bf16.msra.mxu1 %v886_v19  ;;  %v1111_v19 = vsub.s32 1, %v1107_v14 }
  0x54   :  { %456 = vmatprep.subr.bf16.mxu1 %v887_v20  ;;  %v228_v20 = vsub.s32 3, %v1107_v14 }
  0x57   :  { %457 = vmatpush2.bf16.msra.mxu1 %v889_v21  ;;  %v150_v21 = vld [vmem:[%s1148_s4] sm:$0xf] }
  0x58   :  { %458 = vmatprep.subr.bf16.mxu1 %v890_v22 }
  0x5b   :  { %459 = vmatpush2.bf16.msra.mxu1 %v892_v23  ;;  %v1118_v23 = vsub.s32 0, %v1107_v14 }
  0x5c   :  { %460 = vmatprep.subr.bf16.mxu1 %v893_v24  ;;  %v207_v24 = vsub.s32 2, %v1107_v14 }
  0x5f   :  { %461 = vmatpush2.bf16.msra.mxu1 %v895_v25 }
  0x60   :  { %462 = vmatprep.subr.bf16.mxu1 %v896_v26  ;;  %v229_v26 = vrot.slane %v150_v21, %v228_v20 }
  0x63   :  { %463 = vmatpush2.bf16.msra.mxu1 %v898_v27  ;;  %v225_v27 = vrot.slane %v150_v21, %v1111_v19 }
  0x64   :  { %464 = vmatprep.subr.bf16.mxu1 %v899_v28 }
  0x67   :  { %465 = vmatpush2.bf16.msra.mxu1 %v901_v29 }
  0x68   :  { %466 = vmatprep.subr.bf16.mxu1 %v902_v30 }
  0x6b   :  { %467 = vmatpush2.bf16.msra.mxu1 %v904_v31  ;;  %v239_v31 = vrot.slane %v229_v26, %v1111_v19 }
  0x6c   :  { %468 = vmatprep.subr.bf16.mxu1 %v905_v32 }
  0x6f   :  { %469 = vmatpush2.bf16.msra.mxu1 %v907_v33  ;;  %v235_v33 = vrot.slane %v225_v27, %v1111_v19 }
  0x70   :  { %470 = vmatprep.subr.bf16.mxu1 %v908_v34 }
  0x73   :  { %471 = vmatpush2.bf16.msra.mxu1 %v910_v35 }
  0xf9   :  { %v138_v36 = vpop.f32.mrf.mxu0 }
  0xfa   :  { %v151_v37 = vrot.slane %v138_v36, 4 }
  0xfb   :  { %v140_v38 = vpop.f32.mrf.mxu0 }
  0xfc   :  { %v152_v39 = vadd.f32 %v151_v37, %v138_v36  ;;  %v157_v40 = vrot.slane %v140_v38, 4 }
  0xfd   :  { %v142_v41 = vpop.f32.mrf.mxu0 }
  0xfe   :  { %v153_v42 = vrot.slane %v152_v39, 2  ;;  %v158_v43 = vadd.f32 %v157_v40, %v140_v38 }
  0xff   :  { %v143_v44 = vpop.f32.mrf.mxu0 }
 0x100   :  { %v154_v45 = vadd.f32 %v153_v42, %v152_v39  ;;  %v159_v46 = vrot.slane %v158_v43, 2  ;;  %v911_v42 = vld [vmem:[#allocation9 + $0x78] sm:$0xff]   ;;  %v913_v44 = vld [vmem:[#allocation9 + $0x70] sm:$0xff]  }
 0x101   :  { %826 = vmatprep.subr.bf16.mxu0 %v911_v42 }
 0x102   :  { %v155_v47 = vrot.slane %v154_v45, 1  ;;  %v160_v48 = vadd.f32 %v159_v46, %v158_v43  ;;  %v912_v43 = vld [vmem:[#allocation9 + $0x38] sm:$0xff]   ;;  %v915_v46 = vld [vmem:[#allocation9 + $0x68] sm:$0xff]  }
 0x103   :  { %827 = vmatpush3.bf16.msra.mxu0 %v912_v43  ;;  %v490_v43 = vld [vmem:[%s1149_s5] ss:$2 sm:$0x3] }
 0x104   :  { %v156_v49 = vadd.f32 %v155_v47, %v154_v45  ;;  %v161_v50 = vrot.slane %v160_v48, 1  ;;  %v914_v45 = vld [vmem:[#allocation9 + $0x30] sm:$0xff]   ;;  %828 = vmatprep.subr.bf16.mxu0 %v913_v44  ;;  %v916_v47 = vld [vmem:[#allocation9 + $0x28] sm:$0xff]  }
 0x106   :  { %v164_v51 = vmul.f32 0.125, %v156_v49  ;;  %v162_v52 = vadd.f32 %v161_v50, %v160_v48  ;;  %v917_v48 = vld [vmem:[#allocation9 + $0x60] sm:$0xff]   ;;  %v919_v50 = vld [vmem:[#allocation9 + $0x58] sm:$0xff]  }
 0x107   :  { %829 = vmatpush3.bf16.msra.mxu0 %v914_v45  ;;  %v918_v49 = vld [vmem:[#allocation9 + $0x20] sm:$0xff]   ;;  %v808_v45 = vld [vmem:[%s1149_s5 + $0x1] ss:$2 sm:$0x3] }
 0x108   :  { %v166_v53 = vsub.f32 %v138_v36, %v164_v51  ;;  %v165_v54 = vmul.f32 0.125, %v162_v52  ;;  %830 = vmatprep.subr.bf16.mxu0 %v915_v46  ;;  %v920_v51 = vld [vmem:[#allocation9 + $0x18] sm:$0xff]   ;;  %v921_v52 = vld [vmem:[#allocation9 + $0x50] sm:$0xff]  }
 0x10a   :  { %v168_v55 = vmul.f32 %v166_v53, %v166_v53  ;;  %v167_v56 = vsub.f32 %v140_v38, %v165_v54  ;;  %v923_v54 = vld [vmem:[#allocation9 + $0x48] sm:$0xff]  }
 0x10b   :  { %831 = vmatpush3.bf16.msra.mxu0 %v916_v47 }
 0x10c   :  { %v170_v57 = vrot.slane %v168_v55, 4  ;;  %v169_v58 = vmul.f32 %v167_v56, %v167_v56  ;;  %832 = vmatprep.subr.bf16.mxu0 %v917_v48 }
 0x10e   :  { %v171_v59 = vadd.f32 %v170_v57, %v168_v55  ;;  %v176_v60 = vrot.slane %v169_v58, 4  ;;  %v924_v55 = vld [vmem:[#allocation9 + $0x8] sm:$0xff]   ;;  %v926_v57 = vld [vmem:[#allocation9] sm:$0xff]  }
 0x10f   :  { %833 = vmatpush3.bf16.msra.mxu0 %v918_v49  ;;  %v565_v49 = vrot.slane %v808_v45, %v1118_v23 }
 0x110   :  { %v172_v61 = vrot.slane %v171_v59, 2  ;;  %v177_v62 = vadd.f32 %v176_v60, %v169_v58  ;;  %834 = vmatprep.subr.bf16.mxu0 %v919_v50 }
 0x112   :  { %v173_v63 = vadd.f32 %v172_v61, %v171_v59  ;;  %v178_v0 = vrot.slane %v177_v62, 2 }
 0x113   :  { %835 = vmatpush3.bf16.msra.mxu0 %v920_v51 }
 0x114   :  { %v174_v1 = vrot.slane %v173_v63, 1  ;;  %v179_v2 = vadd.f32 %v178_v0, %v177_v62  ;;  %836 = vmatprep.subr.bf16.mxu0 %v921_v52 }
 0x116   :  { %v175_v3 = vadd.f32 %v174_v1, %v173_v63  ;;  %v180_v4 = vrot.slane %v179_v2, 1 }
 0x118   :  { %v182_v5 = vmul.f32 0.125, %v175_v3  ;;  %v181_v6 = vadd.f32 %v180_v4, %v179_v2 }
 0x11a   :  { %v184_v7 = vadd.f32 1e-05, %v182_v5  ;;  %v183_v8 = vmul.f32 0.125, %v181_v6 }
 0x11c   :  { %v185_v9 = vadd.f32 1e-05, %v183_v8  ;;  %927 = vrsqrt.f32 %v184_v7 }
 0x11e   :  { %929 = vrsqrt.f32 %v185_v9 }
 0x129   :  { %v928_v15 = vpop.eup %927 }
 0x12b   :  { %v930_v17 = vpop.eup %929 }
 0x12c   :  { %v190_v18 = vcombine.low %v928_v15, %v930_v17 }
 0x12e   :  { %v197_v22 = vrot.slane %v190_v18, %v196_v16 }
 0x130   :  { %v199_v25 = vmul.f32 %v197_v22, %v150_v21 }
 0x132   :  { %v208_v28 = vrot.slane %v199_v25, %v207_v24  ;;  %v204_v29 = vrot.slane %v199_v25, %v1118_v23 }
 0x134   :  { %v218_v30 = vrot.slane %v208_v28, %v1118_v23  ;;  %v214_v32 = vrot.slane %v204_v29, %v1118_v23 }
 0x136   :  { %v220_v34 = vmul.f32 %v218_v30, %v167_v56  ;;  %v219_v35 = vmul.f32 %v214_v32, %v166_v53  ;;  %v922_v53 = vld [vmem:[#allocation9 + $0x10] sm:$0xff]   ;;  %v925_v56 = vld [vmem:[#allocation9 + $0x40] sm:$0xff]  }
 0x137   :  { %837 = vmatpush3.bf16.msra.mxu0 %v922_v53 }
 0x138   :  { %v241_v36 = vadd.f32 %v239_v31, %v220_v34  ;;  %v240_v37 = vadd.f32 %v235_v33, %v219_v35  ;;  %838 = vmatprep.subr.bf16.mxu0 %v923_v54  ;;  %v1053_v35 = vmov 1966171168  }
 0x13a   :  { %v243_v38 = vmax.f32 %v241_v36, 0.0  ;;  %v242_v39 = vmax.f32 %v240_v37, 0.0  ;;  %v533_v36 = vunpack.c.l.s4 %v1053_v35 }
 0x13b   :  { %839 = vmatpush3.bf16.msra.mxu0 %v924_v55 }
 0x13c   :  { %v247_v40 = vpack.c.bf16 %v243_v38, %v243_v38  ;;  %v246_v41 = vpack.c.bf16 %v242_v39, %v242_v39  ;;  %840 = vmatprep.subr.bf16.mxu0 %v925_v56  ;;  %v534_v37 = vunpack.c.0.s8 %v533_v36 }
 0x13e   :  { %472 = vmatprep.mubr.bf16.mxu1 %v247_v40  ;;  %v537_v39 = vsub.s32 %v534_v37, %v1107_v14  ;;  %v569_v14 = vrot.slane %v808_v45, %v1111_v19 }
 0x13f   :  { %473 = vmatmul.mubr.bf16.vlgmr.msra.gmra.mxu1 %v246_v41  ;;  %841 = vmatpush3.bf16.msra.mxu0 %v926_v57 }
 0x1ff   :  { %v474_v58 = vpop.f32.mrf.mxu1 }
 0x200   :  { %v493_v59 = vrot.slane %v474_v58, 4 }
 0x201   :  { %v476_v60 = vpop.f32.mrf.mxu1 }
 0x202   :  { %v494_v61 = vadd.f32 %v493_v59, %v474_v58  ;;  %v499_v62 = vrot.slane %v476_v60, 4  ;;  %v809_v59 = vld [vmem:[%s1150_s6] ss:$0 sm:$0xff] }
 0x203   :  { %v478_v63 = vpop.f32.mrf.mxu1 }
 0x204   :  { %v495_v0 = vrot.slane %v494_v61, 2  ;;  %v500_v1 = vadd.f32 %v499_v62, %v476_v60 }
 0x205   :  { %v479_v2 = vpop.f32.mrf.mxu1 }
 0x206   :  { %v496_v3 = vadd.f32 %v495_v0, %v494_v61  ;;  %v501_v4 = vrot.slane %v500_v1, 2 }
 0x208   :  { %v497_v5 = vrot.slane %v496_v3, 1  ;;  %v502_v6 = vadd.f32 %v501_v4, %v500_v1 }
 0x20a   :  { %v498_v7 = vadd.f32 %v497_v5, %v496_v3  ;;  %v503_v8 = vrot.slane %v502_v6, 1 }
 0x20c   :  { %v505_v9 = vmul.f32 0.125, %v498_v7  ;;  %v504_v10 = vadd.f32 %v503_v8, %v502_v6 }
 0x20e   :  { %v507_v11 = vsub.f32 %v474_v58, %v505_v9  ;;  %v506_v12 = vmul.f32 0.125, %v504_v10 }
 0x210   :  { %v509_v13 = vmul.f32 %v507_v11, %v507_v11  ;;  %v508_v15 = vsub.f32 %v476_v60, %v506_v12 }
 0x212   :  { %v511_v16 = vrot.slane %v509_v13, 4  ;;  %v510_v17 = vmul.f32 %v508_v15, %v508_v15 }
 0x214   :  { %v512_v18 = vadd.f32 %v511_v16, %v509_v13  ;;  %v517_v20 = vrot.slane %v510_v17, 4 }
 0x216   :  { %v513_v21 = vrot.slane %v512_v18, 2  ;;  %v518_v22 = vadd.f32 %v517_v20, %v510_v17 }
 0x218   :  { %v514_v24 = vadd.f32 %v513_v21, %v512_v18  ;;  %v519_v25 = vrot.slane %v518_v22, 2 }
 0x21a   :  { %v515_v26 = vrot.slane %v514_v24, 1  ;;  %v520_v27 = vadd.f32 %v519_v25, %v518_v22 }
 0x21c   :  { %v516_v28 = vadd.f32 %v515_v26, %v514_v24  ;;  %v521_v29 = vrot.slane %v520_v27, 1 }
 0x21e   :  { %v523_v30 = vmul.f32 0.125, %v516_v28  ;;  %v522_v31 = vadd.f32 %v521_v29, %v520_v27 }
 0x220   :  { %v525_v32 = vadd.f32 1e-05, %v523_v30  ;;  %v524_v33 = vmul.f32 0.125, %v522_v31 }
 0x222   :  { %v526_v34 = vadd.f32 1e-05, %v524_v33  ;;  %931 = vrsqrt.f32 %v525_v32 }
 0x224   :  { %933 = vrsqrt.f32 %v526_v34 }
 0x22f   :  { %v932_v38 = vpop.eup %931 }
 0x231   :  { %v934_v40 = vpop.eup %933 }
 0x232   :  { %v531_v41 = vcombine.low %v932_v38, %v934_v40 }
 0x234   :  { %v538_v42 = vrot.slane %v531_v41, %v537_v39 }
 0x236   :  { %v545_v44 = vrot.slane %v538_v42, %v537_v39 }
 0x238   :  { %v547_v46 = vmul.f32 %v545_v44, %v490_v43 }
 0x23a   :  { %v552_v47 = vrot.slane %v547_v46, %v1118_v23  ;;  %v556_v48 = vrot.slane %v547_v46, %v1111_v19 }
 0x23c   :  { %v560_v50 = vmul.f32 %v556_v48, %v508_v15  ;;  %v559_v51 = vmul.f32 %v552_v47, %v507_v11 }
 0x23e   :  { %v573_v52 = vadd.f32 %v569_v14, %v560_v50  ;;  %v572_v53 = vadd.f32 %v565_v49, %v559_v51 }
 0x240   :  { %v575_v54 = vmax.f32 %v573_v52, 0.0  ;;  %v574_v55 = vmax.f32 %v572_v53, 0.0 }
 0x242   :  { %v577_v56 = vpack.c.bf16 %v575_v54, %v575_v54  ;;  %v576_v57 = vpack.c.bf16 %v574_v55, %v574_v55 }
 0x244   :  { %745 = vmatprep.mubr.bf16.mxu0 %v577_v56 }
 0x245   :  { %746 = vmatmul.mubr.bf16.vlgmr.msra.gmra.mxu0 %v576_v57 }
 0x305   :  { %v842_v58 = vpop.f32.mrf.mxu0 }
 0x307   :  { %v843_v60 = vpop.f32.mrf.mxu0 }
 0x308   :  { %v844_v23 = vadd.f32 %v843_v60, %v842_v58 }
 0x309   :  { %v845_v19 = vpop.f32.mrf.mxu0 }
 0x30a   :  { %v748_v61 = vadd.f32 %v844_v23, %v809_v59 }
 0x30b   :  { %v846_v62 = vpop.f32.mrf.mxu0 }
 0x30c   :  { %753 = vst [vmem:[#allocation11] sm:$0xff] %v748_v61 }
 0x30d   :  { %1026 = shalt.err (!%p1023_p10)
}
 0x30e   :  { %763 = dma.vmem_to_hbm [thread:$0]  %s761_s28, 128, %s1151_s7, [#allocation5]  }
 0x30f   :  { %1041 = dma.done.wait [#allocation5], 128  }
 0x310   :  { %1042 = vsyncadd [#allocation5], 4294967168 }
 0x311   :  { %767 = vsyncpa [#allocation4], 1 }
 0x312   :  { %768 = vsyncpa [#allocation7], 1 }
 0x313   :  { %769 = vsyncpa [#allocation10], 1 }
 0x314   :  { %770 = vsyncpa [#allocation5], 1 }

</bundles_post_ra>
